<compile_context>
chip_gen: v6e
topology: v6e:2x2x1
jax: 0.10.0
libtpu: 0.0.40
codegen_flags: <defaults>
</compile_context>

<pallas_src>
import math
import functools

import jax
import jax.numpy as jnp
from jax.experimental import pallas as pl
from jax.experimental.pallas import tpu as pltpu


def _round_up(n: int, m: int) -> int:
    return ((n + m - 1) // m) * m


def _sinusoidal_kernel(x_ref, table_ref, o_ref, *, groups: int, dim: int):
    """out = sin(x * freqs + phase); the cos half is sin(theta + pi/2) via the phase row."""
    tb, w = o_ref.shape
    freqs = table_ref[0:1, :]            # (1, W)
    phase = table_ref[1:2, :]            # (1, W)

    if groups == 1:
        # (tb, 1) timesteps lane-broadcast against the (1, W) table rows.
        x_b = x_ref[...]
    else:
        # Lane-dense packing: one 128-lane output row holds `groups` consecutive
        # logical rows.  Broadcast timestep k of each packed row to its dim-wide
        # lane group with a short select chain (pure VPU work, which has slack).
        lane = jax.lax.broadcasted_iota(jnp.int32, (tb, w), 1)
        x_b = jnp.broadcast_to(x_ref[:, 0:1], (tb, w))
        for k in range(1, groups):
            xk = jnp.broadcast_to(x_ref[:, k:k + 1], (tb, w))
            x_b = jnp.where(lane >= k * dim, xk, x_b)

    o_ref[...] = jnp.sin(x_b * freqs + phase)


# ~2 MiB output block -> ~4 MiB double-buffered, comfortably below the v5e
# 16 MiB scoped-VMEM default (inputs are a few KiB).
_TARGET_BLOCK_BYTES = 2 * 1024 * 1024


def _choose_row_tile(n_rows: int, row_width: int) -> int:
    """Row tile (in packed rows): size by bytes, keep >=2 grid steps when possible."""
    row_bytes = row_width * 4
    tb = max(8, (_TARGET_BLOCK_BYTES // row_bytes) // 8 * 8)
    tb = min(tb, _round_up(n_rows, 8))
    if n_rows >= 16:
        # Keep at least 2 grid steps so dimension_semantics=("parallel",) can
        # shard the batch across both TensorCores on v7x.
        tb = min(tb, _round_up((n_rows + 1) // 2, 8))
    return max(tb, 8)


def sinusoidal_pos_emb(x: jax.Array, dim: int) -> jax.Array:
    """x: (B,) float timesteps -> (B, dim) float32 sinusoidal embedding."""
    assert dim % 2 == 0 and dim >= 4, f"dim must be even and >= 4, got {dim}"
    half = dim // 2
    B = int(x.shape[0])

    # Host-side table (same formula as the PyTorch module; denominator is half-1).
    freqs = jnp.exp(
        -math.log(10000.0) * jnp.arange(half, dtype=jnp.float32) / (half - 1)
    )
    freqs_row = jnp.concatenate([freqs, freqs])                         # sin | cos halves
    phase_row = jnp.concatenate(
        [jnp.zeros((half,), jnp.float32),
         jnp.full((half,), math.pi / 2, dtype=jnp.float32)]
    )

    # Choose the packed output width W and rows-per-output-row factor `groups`.
    if dim % 128 == 0:
        groups, w = 1, dim                      # already lane-aligned
    elif 128 % dim == 0:
        groups, w = 128 // dim, 128             # lane-dense packing for small dim
        freqs_row = jnp.tile(freqs_row, groups)
        phase_row = jnp.tile(phase_row, groups)
    else:
        groups, w = 1, dim                      # fallback: masked stores, still 1 sin/elem

    table = jnp.stack([freqs_row, phase_row])   # (2, W)

    n_rows = -(-B // groups)                    # packed rows
    tb = _choose_row_tile(n_rows, w)
    n_rows_pad = _round_up(n_rows, tb)          # pad batch to a multiple of the tile
    total = n_rows_pad * groups

    xf = x.astype(jnp.float32).reshape(-1)
    if total != B:
        xf = jnp.pad(xf, (0, total - B))
    x_packed = xf.reshape(n_rows_pad, groups)

    grid = (n_rows_pad // tb,)

    out = pl.pallas_call(
        functools.partial(_sinusoidal_kernel, groups=groups, dim=dim),
        out_shape=jax.ShapeDtypeStruct((n_rows_pad, w), jnp.float32),
        grid_spec=pltpu.PrefetchScalarGridSpec(
            num_scalar_prefetch=0,
            grid=grid,
            in_specs=[
                pl.BlockSpec((tb, groups), lambda i: (i, 0)),   # packed timesteps tile
                pl.BlockSpec((2, w), lambda i: (0, 0)),         # freq/phase table (resident)
            ],
            out_specs=pl.BlockSpec((tb, w), lambda i: (i, 0)),
        ),
        compiler_params=pltpu.CompilerParams(
            dimension_semantics=("parallel",),   # shard batch tiles across TCs (v7x)
        ),
    )(x_packed, table)

    # Row-major packing is contiguous, so this reshape is free; the trailing [:B]
    # is a no-op whenever B already fills the padded rows.
    return out.reshape(n_rows_pad * groups, dim)[:B]


def _reference(x: jax.Array, dim: int) -> jax.Array:
    half = dim // 2
    freqs = jnp.exp(
        -math.log(10000.0) * jnp.arange(half, dtype=jnp.float32) / (half - 1)
    )
    args = x.astype(jnp.float32)[:, None] * freqs[None]
    return jnp.concatenate([jnp.sin(args), jnp.cos(args)], axis=-1)


if __name__ == "__main__":
    key = jax.random.PRNGKey(0)

    # Cases cover: lane-dense packed path (dim=32 -> g=4, dim=64 -> g=2, ragged B),
    # lane-aligned path (dim=128 with a 2-step grid, dim=256), and the general
    # fallback (dim=96, not a divisor/multiple of 128).
    cases = [(8, 32), (40, 64), (64, 128), (16, 256), (12, 96)]

    for B, dim in cases:
        key, sub = jax.random.split(key)
        # Diffusion timesteps (continuous, positive), deterministic per key.
        x = jax.random.uniform(sub, (B,), jnp.float32, minval=0.0, maxval=1000.0)

        out = jax.block_until_ready(sinusoidal_pos_emb(x, dim))
        ref = _reference(x, dim)

        assert out.shape == (B, dim), (out.shape, (B, dim))
        assert out.dtype == jnp.float32, out.dtype
        # Arguments reach ~1000: f32 range reduction (Mosaic vs XLA) plus the
        # rounding of the +pi/2 phase term give ~1e-4-level differences for
        # values bounded in [-1, 1]; 1e-3 is a meaningful but safe tolerance.
        err = float(jnp.max(jnp.abs(out - ref)))
        assert err < 1e-3, (B, dim, err)

    print("KERNEL_OK")
</pallas_src>

<mosaic_0001>
module attributes {stable_mosaic.version = 11 : i64} {
  func.func @_sinusoidal_kernel(%arg0: i32, %arg1: memref<8x4xf32, #tpu.memory_space<vmem>>, %arg2: memref<2x128xf32, #tpu.memory_space<vmem>>, %arg3: memref<8x128xf32, #tpu.memory_space<vmem>>) attributes {dimension_semantics = [#tpu.dimension_semantics<parallel>], iteration_bounds = array<i64: 1>, scalar_prefetch = 0 : i64, scratch_operands = 0 : i64, tpu.core_type = #tpu.core_type<tc>, window_params = [{transform_indices = @transform_0, window_bounds = array<i64: 8, 4>}, {pipeline_mode = #tpu.pipeline_mode<synchronous>, transform_indices = @transform_1, window_bounds = array<i64: 2, 128>}, {transform_indices = @transform_2, window_bounds = array<i64: 8, 128>}]} {
    %c0 = arith.constant 0 : index
    %c0_0 = arith.constant 0 : index
    %0 = vector.load %arg2[%c0, %c0_0] : memref<2x128xf32, #tpu.memory_space<vmem>>, vector<1x128xf32>
    %c1 = arith.constant 1 : index
    %c0_1 = arith.constant 0 : index
    %1 = vector.load %arg2[%c1, %c0_1] : memref<2x128xf32, #tpu.memory_space<vmem>>, vector<1x128xf32>
    %2 = tpu.iota {dimensions = array<i32: 1>} : vector<8x128xi32>
    %c0_2 = arith.constant 0 : index
    %c0_3 = arith.constant 0 : index
    %3 = vector.load %arg1[%c0_2, %c0_3] : memref<8x4xf32, #tpu.memory_space<vmem>>, vector<8x1xf32>
    %4 = vector.shape_cast %3 : vector<8x1xf32> to vector<8x1xf32>
    %5 = vector.broadcast %4 : vector<8x1xf32> to vector<8x128xf32>
    %c0_4 = arith.constant 0 : index
    %c1_5 = arith.constant 1 : index
    %6 = vector.load %arg1[%c0_4, %c1_5] : memref<8x4xf32, #tpu.memory_space<vmem>>, vector<8x1xf32>
    %7 = vector.shape_cast %6 : vector<8x1xf32> to vector<8x1xf32>
    %8 = vector.broadcast %7 : vector<8x1xf32> to vector<8x128xf32>
    %c32_i32 = arith.constant 32 : i32
    %9 = vector.broadcast %c32_i32 : i32 to vector<8x128xi32>
    %10 = arith.cmpi sge, %2, %9 : vector<8x128xi32>
    %11 = arith.select %10, %8, %5 : vector<8x128xi1>, vector<8x128xf32>
    %c0_6 = arith.constant 0 : index
    %c2 = arith.constant 2 : index
    %12 = vector.load %arg1[%c0_6, %c2] : memref<8x4xf32, #tpu.memory_space<vmem>>, vector<8x1xf32>
    %13 = vector.shape_cast %12 : vector<8x1xf32> to vector<8x1xf32>
    %14 = vector.broadcast %13 : vector<8x1xf32> to vector<8x128xf32>
    %c64_i32 = arith.constant 64 : i32
    %15 = vector.broadcast %c64_i32 : i32 to vector<8x128xi32>
    %16 = arith.cmpi sge, %2, %15 : vector<8x128xi32>
    %17 = arith.select %16, %14, %11 : vector<8x128xi1>, vector<8x128xf32>
    %c0_7 = arith.constant 0 : index
    %c3 = arith.constant 3 : index
    %18 = vector.load %arg1[%c0_7, %c3] : memref<8x4xf32, #tpu.memory_space<vmem>>, vector<8x1xf32>
    %19 = vector.shape_cast %18 : vector<8x1xf32> to vector<8x1xf32>
    %20 = vector.broadcast %19 : vector<8x1xf32> to vector<8x128xf32>
    %c96_i32 = arith.constant 96 : i32
    %21 = vector.broadcast %c96_i32 : i32 to vector<8x128xi32>
    %22 = arith.cmpi sge, %2, %21 : vector<8x128xi32>
    %23 = arith.select %22, %20, %17 : vector<8x128xi1>, vector<8x128xf32>
    %24 = vector.broadcast %0 : vector<1x128xf32> to vector<8x128xf32>
    %25 = arith.mulf %23, %24 : vector<8x128xf32>
    %26 = vector.broadcast %1 : vector<1x128xf32> to vector<8x128xf32>
    %27 = arith.addf %25, %26 : vector<8x128xf32>
    %28 = math.sin %27 : vector<8x128xf32>
    %c0_8 = arith.constant 0 : index
    %c0_9 = arith.constant 0 : index
    %29 = vector.load %arg3[%c0_8, %c0_9] : memref<8x128xf32, #tpu.memory_space<vmem>>, vector<8x128xf32>
    tpu.vector_store %arg3[%c0_8, %c0_9], %28 {strides = array<i32>} : memref<8x128xf32, #tpu.memory_space<vmem>>, vector<8x128xf32>,
    return
  }
  func.func @transform_0(%arg0: i32) -> (i32, i32) {
    %c0_i32 = arith.constant 0 : i32
    %c0_i32_0 = arith.constant 0 : i32
    return %arg0, %c0_i32 : i32, i32
  }
  func.func @transform_1(%arg0: i32) -> (i32, i32) {
    %c0_i32 = arith.constant 0 : i32
    %c0_i32_0 = arith.constant 0 : i32
    %c0_i32_1 = arith.constant 0 : i32
    return %c0_i32, %c0_i32_0 : i32, i32
  }
  func.func @transform_2(%arg0: i32) -> (i32, i32) {
    %c0_i32 = arith.constant 0 : i32
    %c0_i32_0 = arith.constant 0 : i32
    return %arg0, %c0_i32 : i32, i32
  }
}

</mosaic_0001>

<bundles_post_ra>
// kernel: tpu_custom_call.1
= control target key start
LH: loop header
LB: loop body
LE: loop exit
PB: predicated region body
PF: predicated region fallthrough
CT: control target
= control target key end

     0   :  { %v221_v1 = vmov 0   ;;  %v222_v2 = vmov 2   ;;  %s280_s0 = inlined_call_operand.vmem [shape: f32[8,4], index: 0, kind: input, shape index: {}]   ;;  %s281_s1 = inlined_call_operand.vmem [shape: f32[2,128], index: 1, kind: input, shape index: {}]   ;;  %s282_s2 = inlined_call_operand.hbm [shape: f32[8,128], index: 2, kind: output, shape index: {}]  }
   0x1   :  { %v16_v0 = vld [vmem:[%s280_s0] sm:$0xff]  ;;  %190 = vset.pattern.permute.xlu0 %v221_v1  ;;  %192 = vset.pattern.permute.xlu1 %v222_v2 }
   0x2   :  { %7 = vsyncpa [#allocation3], 0  ;;  %19 = vperm.xlu0 %190, %v16_v0   ;;  %29 = vperm.xlu1 %192, %v16_v0   ;;  %v223_v3 = vmov 1   ;;  %v224_v4 = vmov 3   ;;  %v14_v5 = vlaneseq  ;;  %v169_v12 = vld [vmem:[%s281_s1] ss:$0 sm:$0xff] }
   0x3   :  { %v170_v14 = vld [vmem:[%s281_s1 + $0x1] ss:$0 sm:$0xff]  ;;  %v225_v28 = vmov 683565275   ;;  %v226_v30 = vmov 2475754826  }
   0x4   :  { %v15_v6 = vand.u32 127, %v14_v5  ;;  %v227_v33 = vmov 2131351028   ;;  %v228_v36 = vmov 2102212464   ;;  %s231_s1 = smov [#allocation2]  }
   0x5   :  { %v229_v39 = vmov 920167782   ;;  %v230_v42 = vmov 1326507024   ;;  %s161_s14 = sshll.u32 %s231_s1, 4  ;;  %s162_s14 = int_to_ptr.vmem [resolvable:$true] %s161_s14 }
   0x6   :  { %191 = vset.pattern.permute.xlu0 %v223_v3  ;;  %193 = vset.pattern.permute.xlu1 %v224_v4  ;;  %vm26_vm0 = vcmp.ge.s32.totalorder %v15_v6, 32  ;;  %vm32_vm1 = vcmp.ge.s32.totalorder %v15_v6, 64  ;;  %vm38_vm2 = vcmp.ge.s32.totalorder %v15_v6, 96  ;;  %s199_s15 = scalar_lea.vmem %s162_s14, 128  ;;  %p204_p1 = scmp.lt.s32.totalorder %s162_s14, %s162_s14 }
   0x7   :  { %23 = vperm.xlu0 %191, %v16_v0   ;;  %35 = vperm.xlu1 %193, %v16_v0   ;;  %p200_p0 = scmp.ne.s32.totalorder %s162_s14, %s199_s15  ;;  %p205_p2 = scmp.lt.s32.totalorder %s199_s15, %s199_s15 }
   0x9   :  { %p206_p3 = por %p205_p2, %p204_p1 }
   0xb   :  { %194 = vset.pattern.permute.xlu0 %v224_v4  ;;  %p207_p4 = pnand %p206_p3, %p200_p0 }
  0x7d   :  { %v20_v7 = vpop.permute.xlu0 %19  ;;  %v30_v8 = vpop.permute.xlu1 %29 }
  0x82   :  { %v24_v9 = vpop.permute.xlu0 %23  ;;  %v36_v10 = vpop.permute.xlu1 %35 }
  0x83   :  { %v27_v11 = vsel %vm26_vm0, %v24_v9, %v20_v7 }
  0x84   :  { %v33_v13 = vsel %vm32_vm1, %v30_v8, %v27_v11 }
  0x85   :  { %v39_v15 = vsel %vm38_vm2, %v36_v10, %v33_v13 }
  0x86   :  { %v44_v16 = vmul.f32 %v169_v12, %v39_v15 }
  0x88   :  { %v256_v17 = vadd.f32 %v170_v14, %v44_v16 }
  0x8a   :  { %v53_v18 = vand.u32 2139095040, %v256_v17  ;;  %v50_v22 = vand.u32 2147483647, %v256_v17  ;;  %vm52_vm10 = vcmp.lt.s32.totalorder %v256_v17, 0  ;;  %vm142_vm15 = vweird.f32 %v256_v17 }
  0x8c   :  { %v54_v19 = vshrl.u32 %v53_v18, 23  ;;  %v57_v26 = vand.u32 8388607, %v50_v22  ;;  %vm51_vm11 = vcmp.le.f32.partialorder %v50_v22, 0.7853982 }
  0x8e   :  { %v171_v20 = vadd.s32 4294967169, %v54_v19  ;;  %v58_v44 = vor.u32 8388608, %v57_v26 }
  0x90   :  { %v60_v21 = vadd.s32 1, %v171_v20  ;;  %v98_v58 = vshll.u32 %v58_v44, 8 }
  0x92   :  { %vm61_vm3 = vcmp.gt.s32.totalorder %v60_v21, 0 }
  0x93   :  { %v62_v23 = vsel %vm61_vm3, %v60_v21, 0 }
  0x94   :  { %v64_v24 = vand.u32 31, %v62_v23  ;;  %v63_v27 = vshrl.u32 %v62_v23, 5 }
  0x96   :  { %v65_v25 = vsub.s32 32, %v64_v24  ;;  %v67_v29 = vshll.u32 %v225_v28, %v64_v24  ;;  %v70_v31 = vshll.u32 %v226_v30, %v64_v24  ;;  %v73_v35 = vshll.u32 %v227_v33, %v64_v24 }
  0x97   :  { %v76_v38 = vshll.u32 %v228_v36, %v64_v24  ;;  %v79_v41 = vshll.u32 %v229_v39, %v64_v24  ;;  %vm82_vm4 = vcmp.lt.s32.totalorder %v63_v27, 1  ;;  %vm85_vm5 = vcmp.lt.s32.totalorder %v63_v27, 4 }
  0x98   :  { %v68_v32 = vshrl.u32 %v226_v30, %v65_v25  ;;  %v71_v34 = vshrl.u32 %v227_v33, %v65_v25  ;;  %v74_v37 = vshrl.u32 %v228_v36, %v65_v25  ;;  %v77_v40 = vshrl.u32 %v229_v39, %v65_v25 }
  0x99   :  { %v80_v43 = vshrl.u32 %v230_v42, %v65_v25  ;;  %v66_v53 = vshrl.u32 %v225_v28, %v65_v25  ;;  %vm84_vm6 = vcmp.lt.s32.totalorder %v63_v27, 3  ;;  %vm83_vm7 = vcmp.lt.s32.totalorder %v63_v27, 2 }
  0x9a   :  { %v69_v45 = vor.u32 %v68_v32, %v67_v29  ;;  %v72_v46 = vor.u32 %v71_v34, %v70_v31  ;;  %v75_v47 = vor.u32 %v74_v37, %v73_v35  ;;  %v78_v48 = vor.u32 %v77_v40, %v76_v38 }
  0x9b   :  { %v81_v49 = vor.u32 %v80_v43, %v79_v41 }
  0x9c   :  { %v87_v50 = vsel %vm85_vm5, %v75_v47, 2102212464  ;;  %v90_v51 = vsel %vm82_vm4, %v69_v45, %v72_v46  ;;  %v94_v52 = vsel %vm82_vm4, %v72_v46, %v75_v47  ;;  %v91_v54 = vsel %vm85_vm5, %v78_v48, 920167782 }
  0x9d   :  { %v95_v55 = vsel %vm85_vm5, %v81_v49, 1326507024  ;;  %v92_v56 = vsel %vm84_vm6, %v75_v47, %v91_v54  ;;  %v86_v59 = vsel %vm82_vm4, %v66_v53, %v69_v45  ;;  %v88_v60 = vsel %vm84_vm6, %v72_v46, %v87_v50 }
  0x9e   :  { %v96_v57 = vsel %vm84_vm6, %v78_v48, %v95_v55  ;;  %v93_v61 = vsel %vm83_vm7, %v90_v51, %v92_v56  ;;  %v89_v3 = vsel %vm83_vm7, %v86_v59, %v88_v60 }
  0x9f   :  { %v97_v62 = vsel %vm83_vm7, %v94_v52, %v96_v57  ;;  %v265_v1 = vmul.u32.u64.low %v98_v58, %v93_v61  ;;  %v266_v2 = vmul.u32.u64.high %v98_v58, %v93_v61, %v265_v1  ;;  %v105_v5 = vmul.u32 %v98_v58, %v89_v3 }
  0xa0   :  { %v262_v63 = vmul.u32.u64.low %v98_v58, %v97_v62  ;;  %v263_v0 = vmul.u32.u64.high %v98_v58, %v97_v62, %v262_v63 }
  0xa1   :  { %v108_v4 = vadd.s32 1, %v266_v2 }
  0xa2   :  { %vm107_vm8 = vc.u32 %v263_v0, %v265_v1  ;;  %v106_v18 = vadd.s32 %v265_v1, %v263_v0 }
  0xa3   :  { %v109_v6 = vsel %vm107_vm8, %v108_v4, %v266_v2 }
  0xa4   :  { %v110_v7 = vadd.s32 %v109_v6, %v105_v5 }
  0xa6   :  { %v111_v8 = vadd.s32 536870912, %v110_v7 }
  0xa8   :  { %v112_v9 = vshrl.u32 %v111_v8, 30 }
  0xaa   :  { %v113_v10 = vshll.u32 %v112_v9, 30  ;;  %v136_v32 = vsub.s32 4, %v112_v9 }
  0xac   :  { %v114_v11 = vsub.s32 %v110_v7, %v113_v10  ;;  %v137_v35 = vsel %vm52_vm10, %v136_v32, %v112_v9 }
  0xad   :  { %v139_v36 = vsel %vm51_vm11, 0, %v137_v35 }
  0xae   :  { %v116_v12 = vsub.s32 0, %v114_v11  ;;  %v143_v37 = vadd.s32 3, %v139_v36 }
  0xb0   :  { %v172_v13 = vmin.u32 %v116_v12, %v114_v11  ;;  %v144_v38 = vand.u32 3, %v143_v37 }
  0xb2   :  { %v118_v14 = vclz %v172_v13  ;;  %vm149_vm12 = vcmp.eq.s32.totalorder %v144_v38, 2  ;;  %vm146_vm13 = vcmp.eq.s32.totalorder %v144_v38, 0  ;;  %vm145_vm14 = vcmp.lt.s32.totalorder %v144_v38, 2 }
  0xb4   :  { %v173_v15 = vadd.s32 4294967294, %v118_v14 }
  0xb6   :  { %vm174_vm9 = vcmp.lt.s32.totalorder %v173_v15, 0 }
  0xb7   :  { %v121_v16 = vsel %vm174_vm9, 0, %v173_v15 }
  0xb8   :  { %v122_v19 = vsub.s32 32, %v121_v16  ;;  %v126_v20 = vsub.s32 4294967266, %v121_v16  ;;  %v123_v21 = vshll.u32 %v114_v11, %v121_v16 }
  0xba   :  { %v124_v23 = vshrl.u32 %v106_v18, %v122_v19  ;;  %v127_v24 = vadd.s32 127, %v126_v20 }
  0xbc   :  { %v125_v25 = vor.u32 %v124_v23, %v123_v21  ;;  %v128_v26 = vshll.u32 %v127_v24, 23 }
  0xbe   :  { %v129_v27 = vor.u32 4788187, %v128_v26  ;;  %v132_v29 = vcvt.s32.f32 %v125_v25 }
  0xc0   :  { %v130_v28 = vand.u32 2147483647, %v129_v27 }
  0xc2   :  { %v133_v30 = vmul.f32 %v132_v29, %v130_v28 }
  0xc4   :  { %v134_v31 = vxor.u32 2147483648, %v133_v30 }
  0xc6   :  { %v135_v33 = vsel %vm52_vm10, %v134_v31, %v133_v30 }
  0xc7   :  { %v138_v34 = vsel %vm51_vm11, %v256_v17, %v135_v33 }
  0xc8   :  { %195 = vcosq.f32 %v138_v34 }
  0xc9   :  { %197 = vsinq.f32 %v138_v34 }
  0xd5   :  { %v196_v39 = vpop.eup %195 }
  0xd6   :  { %v198_v40 = vpop.eup %197  ;;  %v150_v41 = vxor.u32 2147483648, %v196_v39 }
  0xd7   :  { %v147_v42 = vxor.u32 2147483648, %v198_v40 }
  0xd8   :  { %v151_v43 = vsel %vm149_vm12, %v150_v41, %v198_v40 }
  0xd9   :  { %v148_v22 = vsel %vm146_vm13, %v196_v39, %v147_v42 }
  0xda   :  { %v152_v44 = vsel %vm145_vm14, %v148_v22, %v151_v43 }
  0xdb   :  { %v153_v45 = vsel %vm142_vm15, nan, %v152_v44 }
  0xdc   :  { %154 = vst [vmem:[#allocation2] sm:$0xff] %v153_v45 }
  0xdd   :  { %210 = shalt.err (!%p207_p4)
}
  0xde   :  { %164 = dma.vmem_to_hbm [thread:$0]  %s162_s14, 128, %s282_s2, [#allocation3]  }
  0xdf   :  { %219 = dma.done.wait [#allocation3], 128  }
  0xe0   :  { %220 = vsyncadd [#allocation3], 4294967168 }
  0xe1   :  { %168 = vsyncpa [#allocation3], 1 }

</bundles_post_ra>
